<compile_context>
chip_gen: v7x
topology: tpu7x:2x2x1
jax: 0.10.0
libtpu: 0.0.40
codegen_flags: <defaults>
</compile_context>

<pallas_src>
import functools

import jax
import jax.numpy as jnp
from jax.experimental import pallas as pl
from jax.experimental.pallas import tpu as pltpu

_LANE = 128   # lane width (last dim)
_SUB = 8      # sublane granularity (second-to-last dim), f32


def _round_up(n, m):
    return ((n + m - 1) // m) * m


def _fused_linear_kernel(x_ref, w_ref, b_ref, o_ref):
    # Single GEMM on the MXU, f32 accumulation; bias row broadcasts over batch sublanes.
    acc = jnp.dot(x_ref[...], w_ref[...], preferred_element_type=jnp.float32)
    o_ref[...] = (acc + b_ref[...]).astype(o_ref.dtype)


def prepare_fully_connected_params(w1, b1, w2, b2, w3, b3, *, param_dtype=None):
    """Fuse the 3 Linear layers into one (W, b) pair and pad to 128-lane multiples.

    Call ONCE (e.g. at model init) and reuse the result for every forward.
    w_i are (in_i, out_i) (transpose of PyTorch nn.Linear.weight); b_i are (out_i,).
    Returns (Wp, bp, D_in, D_out) with Wp:(Dp_in, Dp_out), bp:(1, Dp_out).
    """
    f32 = jnp.float32
    W = (w1.astype(f32) @ w2.astype(f32)) @ w3.astype(f32)
    b = (b1.astype(f32) @ w2.astype(f32) + b2.astype(f32)) @ w3.astype(f32) + b3.astype(f32)

    D_in, D_out = W.shape
    Dp_in = _round_up(D_in, _LANE)
    Dp_out = _round_up(D_out, _LANE)

    dt = param_dtype if param_dtype is not None else w1.dtype
    Wp = jnp.pad(W, ((0, Dp_in - D_in), (0, Dp_out - D_out))).astype(dt)
    bp = jnp.pad(b, (0, Dp_out - D_out)).reshape(1, Dp_out).astype(dt)
    return Wp, bp, D_in, D_out


def fully_connected_forward(x, Wp, bp, d_out, *, block_b=512):
    """x: (B, D_in) -> (B, d_out), using fused/pre-padded params from
    prepare_fully_connected_params()."""
    B, D_in = x.shape
    Dp_in, Dp_out = Wp.shape
    assert D_in <= Dp_in and d_out <= Dp_out

    # ---- batch tile: >= 2 grid steps when B allows it (v7x megacore), cap at block_b,
    #      and keep batch padding small for large B. ----
    Bp8 = _round_up(B, _SUB)
    n_tiles = max(pl.cdiv(Bp8, block_b), 2) if Bp8 >= 2 * _SUB else 1
    TB = min(_round_up(pl.cdiv(Bp8, n_tiles), _SUB), block_b)
    Bp = _round_up(B, TB)

    # ---- pad activations only when actually needed (aligned-shape fast path) ----
    if (Bp != B) or (Dp_in != D_in):
        xp = jnp.pad(x, ((0, Bp - B), (0, Dp_in - D_in)))
    else:
        xp = x

    grid = (Bp // TB,)

    itemsize_x = jnp.dtype(x.dtype).itemsize
    itemsize_w = jnp.dtype(Wp.dtype).itemsize
    resident_bytes = (Dp_in * Dp_out + Dp_out) * itemsize_w        # W + b, single copy
    pipeline_bytes = 2 * TB * (Dp_in + Dp_out) * itemsize_x        # double-buffered x / out tiles
    acc_bytes = TB * Dp_out * 4                                    # f32 accumulator tile
    vmem_limit = int(min(max(resident_bytes + pipeline_bytes + acc_bytes + (2 << 20),
                             4 << 20),
                         48 << 20))

    flops = 2 * Bp * Dp_in * Dp_out
    bytes_accessed = (itemsize_x * Bp * (Dp_in + Dp_out)
                      + itemsize_w * (Dp_in * Dp_out + Dp_out))

    out_padded = pl.pallas_call(
        _fused_linear_kernel,
        out_shape=jax.ShapeDtypeStruct((Bp, Dp_out), x.dtype),
        grid=grid,
        in_specs=[
            # Batch-tiled activations: auto double-buffered / pipelined across the grid.
            pl.BlockSpec((TB, Dp_in), lambda i: (i, 0)),
            # Fused weight + bias: whole array resident in VMEM, single copy (no pipelining).
            pl.BlockSpec(memory_space=pltpu.MemorySpace.VMEM),
            pl.BlockSpec(memory_space=pltpu.MemorySpace.VMEM),
        ],
        out_specs=pl.BlockSpec((TB, Dp_out), lambda i: (i, 0)),
        compiler_params=pltpu.CompilerParams(
            dimension_semantics=("parallel",),   # batch tiles shard across TCs on v7x
            vmem_limit_bytes=vmem_limit,
        ),
        cost_estimate=pl.CostEstimate(
            flops=flops, transcendentals=0, bytes_accessed=bytes_accessed),
    )(xp, Wp, bp)

    if (Bp != B) or (Dp_out != d_out):
        return out_padded[:B, :d_out]
    return out_padded


def _init_linear(key, fan_in, fan_out, dtype=jnp.float32):
    # Mimics nn.Linear's U(-1/sqrt(fan_in), 1/sqrt(fan_in)); weight stored (in, out).
    kw, kb = jax.random.split(key)
    bound = 1.0 / jnp.sqrt(jnp.float32(fan_in))
    w = jax.random.uniform(kw, (fan_in, fan_out), dtype, -bound, bound)
    b = jax.random.uniform(kb, (fan_out,), dtype, -bound, bound)
    return w, b


if __name__ == "__main__":
    # Fully_Connected(input=32, hidden1=64, hidden2=48, output=16), batch=8
    B, D_IN, H1, H2, D_OUT = 8, 32, 64, 48, 16

    key = jax.random.PRNGKey(0)
    kx, k1, k2, k3 = jax.random.split(key, 4)

    x = jax.random.normal(kx, (B, D_IN), jnp.float32)
    w1, b1 = _init_linear(k1, D_IN, H1)
    w2, b2 = _init_linear(k2, H1, H2)
    w3, b3 = _init_linear(k3, H2, D_OUT)

    # One-time parameter fusion + padding (hoisted out of the per-call forward path).
    Wp, bp, _, _ = prepare_fully_connected_params(w1, b1, w2, b2, w3, b3)

    fwd = jax.jit(functools.partial(fully_connected_forward, d_out=D_OUT))
    out = jax.block_until_ready(fwd(x, Wp, bp))

    # Pure-JAX reference of the original (unfused) forward semantics.
    ref = ((x @ w1 + b1) @ w2 + b2) @ w3 + b3
    assert out.shape == (B, D_OUT)
    assert jnp.allclose(out, ref, atol=1e-3, rtol=1e-3), float(jnp.max(jnp.abs(out - ref)))

    print("KERNEL_OK")
</pallas_src>

<mosaic_0001>
module attributes {stable_mosaic.version = 11 : i64} {
  func.func @_fused_linear_kernel(%arg0: i32, %arg1: memref<8x128xf32, #tpu.memory_space<vmem>>, %arg2: memref<128x128xf32, #tpu.memory_space<vmem>>, %arg3: memref<1x128xf32, #tpu.memory_space<vmem>>, %arg4: memref<8x128xf32, #tpu.memory_space<vmem>>) attributes {dimension_semantics = [#tpu.dimension_semantics<parallel>], iteration_bounds = array<i64: 1>, scalar_prefetch = 0 : i64, scratch_operands = 0 : i64, tpu.core_type = #tpu.core_type<tc>, window_params = [{transform_indices = @transform_0, window_bounds = array<i64: 8, 128>}, {pipeline_mode = #tpu.pipeline_mode<synchronous>, transform_indices = @transform_1, window_bounds = array<i64: 128, 128>}, {pipeline_mode = #tpu.pipeline_mode<synchronous>, transform_indices = @transform_2, window_bounds = array<i64: 1, 128>}, {transform_indices = @transform_3, window_bounds = array<i64: 8, 128>}]} {
    %c0 = arith.constant 0 : index
    %c0_0 = arith.constant 0 : index
    %0 = vector.load %arg1[%c0, %c0_0] : memref<8x128xf32, #tpu.memory_space<vmem>>, vector<8x128xf32>
    %c0_1 = arith.constant 0 : index
    %c0_2 = arith.constant 0 : index
    %1 = vector.load %arg2[%c0_1, %c0_2] : memref<128x128xf32, #tpu.memory_space<vmem>>, vector<128x128xf32>
    %cst = arith.constant dense<0.000000e+00> : vector<8x128xf32>
    %2 = tpu.matmul %0, %1, %cst {dimension_numbers = #tpu.dot_dimension_numbers<[1], [0], [0], [1], [0, 0, 1, 1], [], []>} : vector<8x128xf32>, vector<128x128xf32>, vector<8x128xf32> -> vector<8x128xf32>
    %c0_3 = arith.constant 0 : index
    %c0_4 = arith.constant 0 : index
    %3 = vector.load %arg3[%c0_3, %c0_4] : memref<1x128xf32, #tpu.memory_space<vmem>>, vector<1x128xf32>
    %4 = vector.broadcast %3 : vector<1x128xf32> to vector<8x128xf32>
    %5 = arith.addf %2, %4 : vector<8x128xf32>
    %c0_5 = arith.constant 0 : index
    %c0_6 = arith.constant 0 : index
    %6 = vector.load %arg4[%c0_5, %c0_6] : memref<8x128xf32, #tpu.memory_space<vmem>>, vector<8x128xf32>
    tpu.vector_store %arg4[%c0_5, %c0_6], %5 {strides = array<i32>} : memref<8x128xf32, #tpu.memory_space<vmem>>, vector<8x128xf32>,
    return
  }
  func.func @transform_0(%arg0: i32) -> (i32, i32) {
    %c0_i32 = arith.constant 0 : i32
    %c0_i32_0 = arith.constant 0 : i32
    return %arg0, %c0_i32 : i32, i32
  }
  func.func @transform_1(%arg0: i32) -> (i32, i32) {
    %c0_i32 = arith.constant 0 : i32
    %c0_i32_0 = arith.constant 0 : i32
    %c0_i32_1 = arith.constant 0 : i32
    return %c0_i32, %c0_i32_0 : i32, i32
  }
  func.func @transform_2(%arg0: i32) -> (i32, i32) {
    %c0_i32 = arith.constant 0 : i32
    %c0_i32_0 = arith.constant 0 : i32
    %c0_i32_1 = arith.constant 0 : i32
    return %c0_i32, %c0_i32_0 : i32, i32
  }
  func.func @transform_3(%arg0: i32) -> (i32, i32) {
    %c0_i32 = arith.constant 0 : i32
    %c0_i32_0 = arith.constant 0 : i32
    return %arg0, %c0_i32 : i32, i32
  }
}

</mosaic_0001>

<bundles_post_ra>
// kernel: fully_connected_forward.1
= control target key start
LH: loop header
LB: loop body
LE: loop exit
PB: predicated region body
PF: predicated region fallthrough
CT: control target
= control target key end

     0   :  { %8 = vsyncpa [#allocation3], 0  ;;  %s328_s0 = inlined_call_operand.vmem [shape: f32[8,128], index: 0, kind: input, shape index: {}]   ;;  %s329_s1 = inlined_call_operand.hbm [shape: f32[128,128], index: 1, kind: input, shape index: {}]   ;;  %s330_s2 = inlined_call_operand.vmem [shape: f32[1,128], index: 2, kind: input, shape index: {}]   ;;  %s331_s3 = inlined_call_operand.hbm [shape: f32[8,128], index: 3, kind: output, shape index: {}]  }
   0x1   :  { %9 = vsyncpa [#allocation4], 0  ;;  %s271_s12 = smov [#allocation2]   ;;  %s223_s16 = scalar_lea.hbm %s329_s1, 2048 }
   0x2   :  { %s17_s13 = sshll.u32 %s271_s12, 4  ;;  %p224_p0 = scmp.ne.s32.totalorder %s329_s1, %s223_s16  ;;  %s18_s13 = int_to_ptr.vmem [resolvable:$true] %s17_s13 }
   0x3   :  { %p227_p1 = scmp.lt.u32.totalorder %s223_s16, %s329_s1 }
   0x5   :  { %p229_p2 = pnand %p227_p1, %p224_p0 }
   0x7   :  { %232 = shalt.err (!%p229_p2)
}
   0x8   :  { %s233_s21 = scalar_lea.vmem %s18_s13, 2048  ;;  %p238_p4 = scmp.lt.s32.totalorder %s18_s13, %s18_s13 }
   0x9   :  { %p234_p3 = scmp.ne.s32.totalorder %s18_s13, %s233_s21  ;;  %p239_p5 = scmp.lt.s32.totalorder %s233_s21, %s233_s21 }
   0xb   :  { %p240_p6 = por %p239_p5, %p238_p4 }
   0xd   :  { %p241_p7 = pnand %p240_p6, %p234_p3 }
   0xf   :  { %244 = shalt.err (!%p241_p7)
}
  0x10   :  { %s272_s22 = smov 128   ;;  %s273_s23 = smov 8  }
  0x11   :  { %23 = dma.hbm_to_vmem [thread:$0]  %s329_s1, 2048, %s18_s13, [#allocation3], %s272_s22, %s272_s22, %s273_s23  }
  0x12   :  { %267 = dma.done.wait [#allocation3], 2048  }
  0x13   :  { %268 = vsyncadd [#allocation3], 4294965248  ;;  %v274_v0 = vmov 0.0|0.0   ;;  %vm275_vm0 = vmmov 0   ;;  %v276_v1 = vmov 0.0   ;;  %v30_v2 = vld [vmem:[#allocation2] sm:$0xff] }
  0x14   :  { %192 = vmatprep.subr.bf16.mxu0 %v274_v0  ;;  %189 = vmatprep.mubr.msk.f32.mxu0 %vm275_vm0, %v276_v1  ;;  %v31_v3 = vld [vmem:[#allocation2 + $0x8] sm:$0xff]  ;;  %v32_v4 = vld [vmem:[#allocation2 + $0x10] sm:$0xff]  ;;  %v33_v6 = vld [vmem:[#allocation2 + $0x18] sm:$0xff]  ;;  %s277_s29 = smov [#allocation5]  }
  0x15   :  { %v193_v5 = vpack.c.bf16 %v31_v3, %v30_v2  ;;  %v196_v7 = vpack.c.bf16 %v33_v6, %v32_v4  ;;  %v34_v8 = vld [vmem:[#allocation2 + $0x20] sm:$0xff]  ;;  %v35_v9 = vld [vmem:[#allocation2 + $0x28] sm:$0xff]  ;;  %v36_v11 = vld [vmem:[#allocation2 + $0x30] sm:$0xff]  ;;  %s130_s30 = sshll.u32 %s277_s29, 4  ;;  %s131_s30 = int_to_ptr.vmem [resolvable:$true] %s130_s30 }
  0x16   :  { %v199_v10 = vpack.c.bf16 %v35_v9, %v34_v8  ;;  %v37_v12 = vld [vmem:[#allocation2 + $0x38] sm:$0xff]  ;;  %v38_v14 = vld [vmem:[#allocation2 + $0x40] sm:$0xff]  ;;  %v39_v15 = vld [vmem:[#allocation2 + $0x48] sm:$0xff]  ;;  %s245_s4 = scalar_lea.vmem %s131_s30, 128  ;;  %p250_p9 = scmp.lt.s32.totalorder %s131_s30, %s131_s30 }
  0x17   :  { %194 = vmatpush3.bf16.msra.mxu0 %v193_v5  ;;  %v202_v13 = vpack.c.bf16 %v37_v12, %v36_v11  ;;  %v205_v16 = vpack.c.bf16 %v39_v15, %v38_v14  ;;  %v40_v17 = vld [vmem:[#allocation2 + $0x50] sm:$0xff]  ;;  %v41_v18 = vld [vmem:[#allocation2 + $0x58] sm:$0xff]  ;;  %v42_v20 = vld [vmem:[#allocation2 + $0x60] sm:$0xff]  ;;  %p246_p8 = scmp.ne.s32.totalorder %s131_s30, %s245_s4  ;;  %p251_p10 = scmp.lt.s32.totalorder %s245_s4, %s245_s4 }
  0x18   :  { %195 = vmatprep.subr.bf16.mxu0 %v274_v0  ;;  %v208_v19 = vpack.c.bf16 %v41_v18, %v40_v17  ;;  %v43_v21 = vld [vmem:[#allocation2 + $0x68] sm:$0xff]  ;;  %v44_v23 = vld [vmem:[#allocation2 + $0x70] sm:$0xff]  ;;  %v45_v24 = vld [vmem:[#allocation2 + $0x78] sm:$0xff] }
  0x19   :  { %v211_v22 = vpack.c.bf16 %v43_v21, %v42_v20  ;;  %v214_v25 = vpack.c.bf16 %v45_v24, %v44_v23  ;;  %v29_v26 = vld [vmem:[%s328_s0] sm:$0xff]  ;;  %p252_p11 = por %p251_p10, %p250_p9 }
  0x1a   :  { %v139_v27 = vld [vmem:[%s330_s2] ss:$0 sm:$0xff] }
  0x1b   :  { %197 = vmatpush3.bf16.msra.mxu0 %v196_v7  ;;  %p253_p12 = pnand %p252_p11, %p246_p8 }
  0x1c   :  { %198 = vmatprep.subr.bf16.mxu0 %v274_v0 }
  0x1f   :  { %200 = vmatpush3.bf16.msra.mxu0 %v199_v10 }
  0x20   :  { %201 = vmatprep.subr.bf16.mxu0 %v274_v0 }
  0x23   :  { %203 = vmatpush3.bf16.msra.mxu0 %v202_v13 }
  0x24   :  { %204 = vmatprep.subr.bf16.mxu0 %v274_v0 }
  0x27   :  { %206 = vmatpush3.bf16.msra.mxu0 %v205_v16 }
  0x28   :  { %207 = vmatprep.subr.bf16.mxu0 %v274_v0 }
  0x2b   :  { %209 = vmatpush3.bf16.msra.mxu0 %v208_v19 }
  0x2c   :  { %210 = vmatprep.subr.bf16.mxu0 %v274_v0 }
  0x2f   :  { %212 = vmatpush3.bf16.msra.mxu0 %v211_v22 }
  0x30   :  { %213 = vmatprep.subr.bf16.mxu0 %v274_v0 }
  0x33   :  { %215 = vmatpush3.bf16.msra.mxu0 %v214_v25 }
  0x36   :  { %190 = vmatmul.mubr.f32.vlgmr.msra.gmra.mrb[0].mxu0 %v29_v26 }
 0x109   :  { %v119_v28 = vpop.f32.mrb[0].mxu0 }
 0x10a   :  { %v120_v29 = vadd.f32 %v139_v27, %v119_v28  ;;  %v191_v30 = vpop.f32.mrb[1].mxu0 }
 0x10c   :  { %123 = vst [vmem:[#allocation5] sm:$0xff] %v120_v29 }
 0x10d   :  { %256 = shalt.err (!%p253_p12)
}
 0x10e   :  { %s257_s6 = scalar_lea.hbm %s331_s3, 128 }
 0x10f   :  { %p258_p13 = scmp.ne.s32.totalorder %s331_s3, %s257_s6  ;;  %p261_p0 = scmp.lt.u32.totalorder %s257_s6, %s331_s3 }
 0x111   :  { %p263_p1 = pnand %p261_p0, %p258_p13 }
 0x113   :  { %266 = shalt.err (!%p263_p1)
}
 0x114   :  { %133 = dma.vmem_to_hbm [thread:$0]  %s131_s30, 128, %s331_s3, [#allocation4]  }
 0x115   :  { %269 = dma.done.wait [#allocation4], 128  }
 0x116   :  { %270 = vsyncadd [#allocation4], 4294967168 }
 0x117   :  { %137 = vsyncpa [#allocation3], 1 }
 0x118   :  { %138 = vsyncpa [#allocation4], 1 }

</bundles_post_ra>
